<compile_context>
chip_gen: v6e
topology: v6e:2x2x1
jax: 0.10.0
libtpu: 0.0.40
codegen_flags: <defaults>
</compile_context>

<pallas_src>
import functools

import numpy as np
import jax
import jax.numpy as jnp
from jax.experimental import pallas as pl
from jax.experimental.pallas import tpu as pltpu


def _tap_masks(H, W):
    """(9, H*W) {0,1} masks: mask[k, q] == 1 iff tap k of a SAME 3x3 conv at
    output pixel q stays inside the image (does not read the zero padding)."""
    masks = np.zeros((9, H * W), np.float32)
    for k in range(9):
        dy, dx = divmod(k, 3)
        row_ok = (np.arange(H) + dy - 1 >= 0) & (np.arange(H) + dy - 1 < H)
        col_ok = (np.arange(W) + dx - 1 >= 0) & (np.arange(W) + dx - 1 < W)
        masks[k] = (row_ok[:, None] & col_ok[None, :]).reshape(-1)
    return masks


def _resblock_kernel(x_ref, w1_ref, b1_ref, w2_ref, b2_ref, mask_ref, out_ref,
                     *, width):
    # x_ref:    (1, C, H*W)  one batch item; channels on sublanes, pixels on lanes
    # w*_ref:   (C, 9*C)     column index = (3*dy + dx)*C + ci
    # b*_ref:   (C, 1)
    # mask_ref: (9, H*W)     per-tap border-validity mask
    # out_ref:  (1, C, H*W)  lane-dense output (H*W multiple of 128)
    C, HW = x_ref.shape[1], x_ref.shape[2]
    x = x_ref[0]              # (C, HW)
    masks = mask_ref[...]     # (9, HW)

    def conv3x3(a, w_ref, b_ref):
        # im2col via lane rolls: patch[(k*C + ci), q] = a[ci, q + off_k],
        # zeroed wherever the tap would read outside the image.
        parts = []
        for k in range(9):
            dy, dx = divmod(k, 3)
            off = (dy - 1) * width + (dx - 1)
            if off == 0:                              # center tap: identity
                parts.append(a)
            else:
                shifted = pltpu.roll(a, shift=(-off) % HW, axis=1)  # XLU
                parts.append(shifted * masks[k:k + 1, :])           # VPU
        patches = jnp.concatenate(parts, axis=0)                    # (9C, HW)
        acc = jnp.dot(w_ref[...], patches,            # single MXU dot, K = 9C
                      preferred_element_type=jnp.float32)           # (C, HW) f32
        return acc + b_ref[...].astype(jnp.float32)

    y1 = jnp.maximum(conv3x3(x, w1_ref, b1_ref), 0.0).astype(x.dtype)  # ReLU
    y2 = conv3x3(y1, w2_ref, b2_ref)
    out = jnp.maximum(y2 + x.astype(jnp.float32), 0.0)   # residual + final ReLU
    out_ref[0] = out.astype(out_ref.dtype)


@functools.partial(jax.jit, static_argnames=("compute_dtype",))
def resblock_pallas(x_nchw, w1, b1, w2, b2, *, compute_dtype=None):
    """x_nchw: (N, C, H, W).  w*: (3, 3, C, C) HWIO.  b*: (C,).

    compute_dtype: None -> keep input dtype (exact f32); jnp.bfloat16 for
    v6e/v7x MXU-optimal operands (accumulation stays f32 in-kernel).
    """
    N, C, H, W = x_nchw.shape
    HW = H * W
    cdt = x_nchw.dtype if compute_dtype is None else compute_dtype

    x_flat = x_nchw.reshape(N, C, HW).astype(cdt)          # free reshape (NCHW)
    wmat1 = w1.reshape(9 * C, C).T.astype(cdt)             # (C, 9C)
    wmat2 = w2.reshape(9 * C, C).T.astype(cdt)
    b1c = b1.reshape(C, 1).astype(jnp.float32)
    b2c = b2.reshape(C, 1).astype(jnp.float32)
    masks = jnp.asarray(_tap_masks(H, W)).astype(cdt)      # (9, HW) constant

    kernel = functools.partial(_resblock_kernel, width=W)

    out_flat = pl.pallas_call(
        kernel,
        out_shape=jax.ShapeDtypeStruct((N, C, HW), x_nchw.dtype),
        grid_spec=pltpu.PrefetchScalarGridSpec(
            num_scalar_prefetch=0,
            grid=(N,),
            in_specs=[
                pl.BlockSpec((1, C, HW), lambda n: (n, 0, 0)),
                pl.BlockSpec((C, 9 * C), lambda n: (0, 0)),
                pl.BlockSpec((C, 1), lambda n: (0, 0)),
                pl.BlockSpec((C, 9 * C), lambda n: (0, 0)),
                pl.BlockSpec((C, 1), lambda n: (0, 0)),
                pl.BlockSpec((9, HW), lambda n: (0, 0)),
            ],
            out_specs=pl.BlockSpec((1, C, HW), lambda n: (n, 0, 0)),
        ),
        compiler_params=pltpu.CompilerParams(
            dimension_semantics=("parallel",)),
    )(x_flat, wmat1, b1c, wmat2, b2c, masks)

    return out_flat.reshape(N, C, H, W)                    # free reshape (NCHW)


def _reference(x_nchw, w1, b1, w2, b2):
    """Pure-JAX reference (lax conv) for verification."""
    x = jnp.transpose(x_nchw, (0, 2, 3, 1))
    dn = ("NHWC", "HWIO", "NHWC")
    y = jax.lax.conv_general_dilated(x, w1, (1, 1), "SAME", dimension_numbers=dn)
    y = jnp.maximum(y + b1[None, None, None, :], 0.0)
    y = jax.lax.conv_general_dilated(y, w2, (1, 1), "SAME", dimension_numbers=dn)
    y = jnp.maximum(y + b2[None, None, None, :] + x, 0.0)
    return jnp.transpose(y, (0, 3, 1, 2))


if __name__ == "__main__":
    key = jax.random.PRNGKey(0)
    k_x, k_w1, k_b1, k_w2, k_b2 = jax.random.split(key, 5)

    N, C, H, W = 2, 4, 16, 16          # n_chn = 4
    x = jax.random.normal(k_x, (N, C, H, W), jnp.float32)

    # Deterministic synthetic parameters (HWIO layout: (kh, kw, Cin, Cout)).
    w1 = jax.random.normal(k_w1, (3, 3, C, C), jnp.float32) * 0.1
    b1 = jax.random.normal(k_b1, (C,), jnp.float32) * 0.1
    w2 = jax.random.normal(k_w2, (3, 3, C, C), jnp.float32) * 0.1
    b2 = jax.random.normal(k_b2, (C,), jnp.float32) * 0.1

    out = resblock_pallas(x, w1, b1, w2, b2)
    out = jax.block_until_ready(out)

    ref = _reference(x, w1, b1, w2, b2)
    assert out.shape == (N, C, H, W)
    assert jnp.allclose(out, ref, atol=1e-4, rtol=1e-4), "mismatch vs reference"

    print("KERNEL_OK")
</pallas_src>

<mosaic_0001>
module attributes {stable_mosaic.version = 11 : i64} {
  func.func @_resblock_kernel(%arg0: i32, %arg1: memref<1x4x256xf32, #tpu.memory_space<vmem>>, %arg2: memref<4x36xf32, #tpu.memory_space<vmem>>, %arg3: memref<4x1xf32, #tpu.memory_space<vmem>>, %arg4: memref<4x36xf32, #tpu.memory_space<vmem>>, %arg5: memref<4x1xf32, #tpu.memory_space<vmem>>, %arg6: memref<9x256xf32, #tpu.memory_space<vmem>>, %arg7: memref<1x4x256xf32, #tpu.memory_space<vmem>>) attributes {dimension_semantics = [#tpu.dimension_semantics<parallel>], iteration_bounds = array<i64: 2>, scalar_prefetch = 0 : i64, scratch_operands = 0 : i64, tpu.core_type = #tpu.core_type<tc>, window_params = [{transform_indices = @transform_0, window_bounds = array<i64: 1, 4, 256>}, {pipeline_mode = #tpu.pipeline_mode<synchronous>, transform_indices = @transform_1, window_bounds = array<i64: 4, 36>}, {pipeline_mode = #tpu.pipeline_mode<synchronous>, transform_indices = @transform_2, window_bounds = array<i64: 4, 1>}, {pipeline_mode = #tpu.pipeline_mode<synchronous>, transform_indices = @transform_3, window_bounds = array<i64: 4, 36>}, {pipeline_mode = #tpu.pipeline_mode<synchronous>, transform_indices = @transform_4, window_bounds = array<i64: 4, 1>}, {pipeline_mode = #tpu.pipeline_mode<synchronous>, transform_indices = @transform_5, window_bounds = array<i64: 9, 256>}, {transform_indices = @transform_6, window_bounds = array<i64: 1, 4, 256>}]} {
    %c0 = arith.constant 0 : index
    %c0_0 = arith.constant 0 : index
    %c0_1 = arith.constant 0 : index
    %0 = vector.load %arg1[%c0, %c0_0, %c0_1] : memref<1x4x256xf32, #tpu.memory_space<vmem>>, vector<1x4x256xf32>
    %1 = vector.shape_cast %0 : vector<1x4x256xf32> to vector<4x256xf32>
    %c0_2 = arith.constant 0 : index
    %c0_3 = arith.constant 0 : index
    %2 = vector.load %arg6[%c0_2, %c0_3] : memref<9x256xf32, #tpu.memory_space<vmem>>, vector<9x256xf32>
    %c17_i32 = arith.constant 17 : i32
    %3 = tpu.dynamic_rotate %1 by %c17_i32 dim 1 : vector<4x256xf32>, i32 -> vector<4x256xf32>
    %4 = vector.extract_strided_slice %2 {offsets = [0, 0], sizes = [1, 256], strides = [1, 1]} : vector<9x256xf32> to vector<1x256xf32>
    %5 = vector.broadcast %4 : vector<1x256xf32> to vector<4x256xf32>
    %6 = arith.mulf %3, %5 : vector<4x256xf32>
    %c16_i32 = arith.constant 16 : i32
    %7 = tpu.dynamic_rotate %1 by %c16_i32 dim 1 : vector<4x256xf32>, i32 -> vector<4x256xf32>
    %8 = vector.extract_strided_slice %2 {offsets = [1, 0], sizes = [1, 256], strides = [1, 1]} : vector<9x256xf32> to vector<1x256xf32>
    %9 = vector.broadcast %8 : vector<1x256xf32> to vector<4x256xf32>
    %10 = arith.mulf %7, %9 : vector<4x256xf32>
    %c15_i32 = arith.constant 15 : i32
    %11 = tpu.dynamic_rotate %1 by %c15_i32 dim 1 : vector<4x256xf32>, i32 -> vector<4x256xf32>
    %12 = vector.extract_strided_slice %2 {offsets = [2, 0], sizes = [1, 256], strides = [1, 1]} : vector<9x256xf32> to vector<1x256xf32>
    %13 = vector.broadcast %12 : vector<1x256xf32> to vector<4x256xf32>
    %14 = arith.mulf %11, %13 : vector<4x256xf32>
    %c1_i32 = arith.constant 1 : i32
    %15 = tpu.dynamic_rotate %1 by %c1_i32 dim 1 : vector<4x256xf32>, i32 -> vector<4x256xf32>
    %16 = vector.extract_strided_slice %2 {offsets = [3, 0], sizes = [1, 256], strides = [1, 1]} : vector<9x256xf32> to vector<1x256xf32>
    %17 = vector.broadcast %16 : vector<1x256xf32> to vector<4x256xf32>
    %18 = arith.mulf %15, %17 : vector<4x256xf32>
    %c255_i32 = arith.constant 255 : i32
    %19 = tpu.dynamic_rotate %1 by %c255_i32 dim 1 : vector<4x256xf32>, i32 -> vector<4x256xf32>
    %20 = vector.extract_strided_slice %2 {offsets = [5, 0], sizes = [1, 256], strides = [1, 1]} : vector<9x256xf32> to vector<1x256xf32>
    %21 = vector.broadcast %20 : vector<1x256xf32> to vector<4x256xf32>
    %22 = arith.mulf %19, %21 : vector<4x256xf32>
    %c241_i32 = arith.constant 241 : i32
    %23 = tpu.dynamic_rotate %1 by %c241_i32 dim 1 : vector<4x256xf32>, i32 -> vector<4x256xf32>
    %24 = vector.extract_strided_slice %2 {offsets = [6, 0], sizes = [1, 256], strides = [1, 1]} : vector<9x256xf32> to vector<1x256xf32>
    %25 = vector.broadcast %24 : vector<1x256xf32> to vector<4x256xf32>
    %26 = arith.mulf %23, %25 : vector<4x256xf32>
    %c240_i32 = arith.constant 240 : i32
    %27 = tpu.dynamic_rotate %1 by %c240_i32 dim 1 : vector<4x256xf32>, i32 -> vector<4x256xf32>
    %28 = vector.extract_strided_slice %2 {offsets = [7, 0], sizes = [1, 256], strides = [1, 1]} : vector<9x256xf32> to vector<1x256xf32>
    %29 = vector.broadcast %28 : vector<1x256xf32> to vector<4x256xf32>
    %30 = arith.mulf %27, %29 : vector<4x256xf32>
    %c239_i32 = arith.constant 239 : i32
    %31 = tpu.dynamic_rotate %1 by %c239_i32 dim 1 : vector<4x256xf32>, i32 -> vector<4x256xf32>
    %32 = vector.extract_strided_slice %2 {offsets = [8, 0], sizes = [1, 256], strides = [1, 1]} : vector<9x256xf32> to vector<1x256xf32>
    %33 = vector.broadcast %32 : vector<1x256xf32> to vector<4x256xf32>
    %34 = arith.mulf %31, %33 : vector<4x256xf32>
    %35 = tpu.concatenate %6, %10, %14, %18, %1, %22, %26, %30, %34 in 0 : vector<4x256xf32>, vector<4x256xf32>, vector<4x256xf32>, vector<4x256xf32>, vector<4x256xf32>, vector<4x256xf32>, vector<4x256xf32>, vector<4x256xf32>, vector<4x256xf32> -> vector<36x256xf32>
    %c0_4 = arith.constant 0 : index
    %c0_5 = arith.constant 0 : index
    %36 = vector.load %arg2[%c0_4, %c0_5] : memref<4x36xf32, #tpu.memory_space<vmem>>, vector<4x36xf32>
    %cst = arith.constant dense<0.000000e+00> : vector<4x256xf32>
    %37 = tpu.matmul %36, %35, %cst {dimension_numbers = #tpu.dot_dimension_numbers<[1], [0], [0], [1], [0, 0, 1, 1], [], []>} : vector<4x36xf32>, vector<36x256xf32>, vector<4x256xf32> -> vector<4x256xf32>
    %c0_6 = arith.constant 0 : index
    %c0_7 = arith.constant 0 : index
    %38 = vector.load %arg3[%c0_6, %c0_7] : memref<4x1xf32, #tpu.memory_space<vmem>>, vector<4x1xf32>
    %39 = vector.broadcast %38 : vector<4x1xf32> to vector<4x256xf32>
    %40 = arith.addf %37, %39 : vector<4x256xf32>
    %cst_8 = arith.constant 0.000000e+00 : f32
    %41 = vector.broadcast %cst_8 : f32 to vector<4x256xf32>
    %42 = arith.maximumf %40, %41 : vector<4x256xf32>
    %c17_i32_9 = arith.constant 17 : i32
    %43 = tpu.dynamic_rotate %42 by %c17_i32_9 dim 1 : vector<4x256xf32>, i32 -> vector<4x256xf32>
    %44 = vector.extract_strided_slice %2 {offsets = [0, 0], sizes = [1, 256], strides = [1, 1]} : vector<9x256xf32> to vector<1x256xf32>
    %45 = vector.broadcast %44 : vector<1x256xf32> to vector<4x256xf32>
    %46 = arith.mulf %43, %45 : vector<4x256xf32>
    %c16_i32_10 = arith.constant 16 : i32
    %47 = tpu.dynamic_rotate %42 by %c16_i32_10 dim 1 : vector<4x256xf32>, i32 -> vector<4x256xf32>
    %48 = vector.extract_strided_slice %2 {offsets = [1, 0], sizes = [1, 256], strides = [1, 1]} : vector<9x256xf32> to vector<1x256xf32>
    %49 = vector.broadcast %48 : vector<1x256xf32> to vector<4x256xf32>
    %50 = arith.mulf %47, %49 : vector<4x256xf32>
    %c15_i32_11 = arith.constant 15 : i32
    %51 = tpu.dynamic_rotate %42 by %c15_i32_11 dim 1 : vector<4x256xf32>, i32 -> vector<4x256xf32>
    %52 = vector.extract_strided_slice %2 {offsets = [2, 0], sizes = [1, 256], strides = [1, 1]} : vector<9x256xf32> to vector<1x256xf32>
    %53 = vector.broadcast %52 : vector<1x256xf32> to vector<4x256xf32>
    %54 = arith.mulf %51, %53 : vector<4x256xf32>
    %c1_i32_12 = arith.constant 1 : i32
    %55 = tpu.dynamic_rotate %42 by %c1_i32_12 dim 1 : vector<4x256xf32>, i32 -> vector<4x256xf32>
    %56 = vector.extract_strided_slice %2 {offsets = [3, 0], sizes = [1, 256], strides = [1, 1]} : vector<9x256xf32> to vector<1x256xf32>
    %57 = vector.broadcast %56 : vector<1x256xf32> to vector<4x256xf32>
    %58 = arith.mulf %55, %57 : vector<4x256xf32>
    %c255_i32_13 = arith.constant 255 : i32
    %59 = tpu.dynamic_rotate %42 by %c255_i32_13 dim 1 : vector<4x256xf32>, i32 -> vector<4x256xf32>
    %60 = vector.extract_strided_slice %2 {offsets = [5, 0], sizes = [1, 256], strides = [1, 1]} : vector<9x256xf32> to vector<1x256xf32>
    %61 = vector.broadcast %60 : vector<1x256xf32> to vector<4x256xf32>
    %62 = arith.mulf %59, %61 : vector<4x256xf32>
    %c241_i32_14 = arith.constant 241 : i32
    %63 = tpu.dynamic_rotate %42 by %c241_i32_14 dim 1 : vector<4x256xf32>, i32 -> vector<4x256xf32>
    %64 = vector.extract_strided_slice %2 {offsets = [6, 0], sizes = [1, 256], strides = [1, 1]} : vector<9x256xf32> to vector<1x256xf32>
    %65 = vector.broadcast %64 : vector<1x256xf32> to vector<4x256xf32>
    %66 = arith.mulf %63, %65 : vector<4x256xf32>
    %c240_i32_15 = arith.constant 240 : i32
    %67 = tpu.dynamic_rotate %42 by %c240_i32_15 dim 1 : vector<4x256xf32>, i32 -> vector<4x256xf32>
    %68 = vector.extract_strided_slice %2 {offsets = [7, 0], sizes = [1, 256], strides = [1, 1]} : vector<9x256xf32> to vector<1x256xf32>
    %69 = vector.broadcast %68 : vector<1x256xf32> to vector<4x256xf32>
    %70 = arith.mulf %67, %69 : vector<4x256xf32>
    %c239_i32_16 = arith.constant 239 : i32
    %71 = tpu.dynamic_rotate %42 by %c239_i32_16 dim 1 : vector<4x256xf32>, i32 -> vector<4x256xf32>
    %72 = vector.extract_strided_slice %2 {offsets = [8, 0], sizes = [1, 256], strides = [1, 1]} : vector<9x256xf32> to vector<1x256xf32>
    %73 = vector.broadcast %72 : vector<1x256xf32> to vector<4x256xf32>
    %74 = arith.mulf %71, %73 : vector<4x256xf32>
    %75 = tpu.concatenate %46, %50, %54, %58, %42, %62, %66, %70, %74 in 0 : vector<4x256xf32>, vector<4x256xf32>, vector<4x256xf32>, vector<4x256xf32>, vector<4x256xf32>, vector<4x256xf32>, vector<4x256xf32>, vector<4x256xf32>, vector<4x256xf32> -> vector<36x256xf32>
    %c0_17 = arith.constant 0 : index
    %c0_18 = arith.constant 0 : index
    %76 = vector.load %arg4[%c0_17, %c0_18] : memref<4x36xf32, #tpu.memory_space<vmem>>, vector<4x36xf32>
    %cst_19 = arith.constant dense<0.000000e+00> : vector<4x256xf32>
    %77 = tpu.matmul %76, %75, %cst_19 {dimension_numbers = #tpu.dot_dimension_numbers<[1], [0], [0], [1], [0, 0, 1, 1], [], []>} : vector<4x36xf32>, vector<36x256xf32>, vector<4x256xf32> -> vector<4x256xf32>
    %c0_20 = arith.constant 0 : index
    %c0_21 = arith.constant 0 : index
    %78 = vector.load %arg5[%c0_20, %c0_21] : memref<4x1xf32, #tpu.memory_space<vmem>>, vector<4x1xf32>
    %79 = vector.broadcast %78 : vector<4x1xf32> to vector<4x256xf32>
    %80 = arith.addf %77, %79 : vector<4x256xf32>
    %81 = arith.addf %80, %1 : vector<4x256xf32>
    %cst_22 = arith.constant 0.000000e+00 : f32
    %82 = vector.broadcast %cst_22 : f32 to vector<4x256xf32>
    %83 = arith.maximumf %81, %82 : vector<4x256xf32>
    %c0_23 = arith.constant 0 : index
    %c0_24 = arith.constant 0 : index
    %c0_25 = arith.constant 0 : index
    %84 = vector.load %arg7[%c0_23, %c0_24, %c0_25] : memref<1x4x256xf32, #tpu.memory_space<vmem>>, vector<1x4x256xf32>
    %85 = vector.shape_cast %84 : vector<1x4x256xf32> to vector<4x256xf32>
    %86 = vector.shape_cast %83 : vector<4x256xf32> to vector<1x4x256xf32>
    tpu.vector_store %arg7[%c0_23, %c0_24, %c0_25], %86 {strides = array<i32>} : memref<1x4x256xf32, #tpu.memory_space<vmem>>, vector<1x4x256xf32>,
    return
  }
  func.func @transform_0(%arg0: i32) -> (i32, i32, i32) {
    %c0_i32 = arith.constant 0 : i32
    %c0_i32_0 = arith.constant 0 : i32
    %c0_i32_1 = arith.constant 0 : i32
    return %arg0, %c0_i32, %c0_i32_0 : i32, i32, i32
  }
  func.func @transform_1(%arg0: i32) -> (i32, i32) {
    %c0_i32 = arith.constant 0 : i32
    %c0_i32_0 = arith.constant 0 : i32
    %c0_i32_1 = arith.constant 0 : i32
    return %c0_i32, %c0_i32_0 : i32, i32
  }
  func.func @transform_2(%arg0: i32) -> (i32, i32) {
    %c0_i32 = arith.constant 0 : i32
    %c0_i32_0 = arith.constant 0 : i32
    %c0_i32_1 = arith.constant 0 : i32
    return %c0_i32, %c0_i32_0 : i32, i32
  }
  func.func @transform_3(%arg0: i32) -> (i32, i32) {
    %c0_i32 = arith.constant 0 : i32
    %c0_i32_0 = arith.constant 0 : i32
    %c0_i32_1 = arith.constant 0 : i32
    return %c0_i32, %c0_i32_0 : i32, i32
  }
  func.func @transform_4(%arg0: i32) -> (i32, i32) {
    %c0_i32 = arith.constant 0 : i32
    %c0_i32_0 = arith.constant 0 : i32
    %c0_i32_1 = arith.constant 0 : i32
    return %c0_i32, %c0_i32_0 : i32, i32
  }
  func.func @transform_5(%arg0: i32) -> (i32, i32) {
    %c0_i32 = arith.constant 0 : i32
    %c0_i32_0 = arith.constant 0 : i32
    %c0_i32_1 = arith.constant 0 : i32
    return %c0_i32, %c0_i32_0 : i32, i32
  }
  func.func @transform_6(%arg0: i32) -> (i32, i32, i32) {
    %c0_i32 = arith.constant 0 : i32
    %c0_i32_0 = arith.constant 0 : i32
    %c0_i32_1 = arith.constant 0 : i32
    return %arg0, %c0_i32, %c0_i32_0 : i32, i32, i32
  }
}

</mosaic_0001>

<bundles_post_ra>
// kernel: resblock_pallas.1
= control target key start
LH: loop header
LB: loop body
LE: loop exit
PB: predicated region body
PF: predicated region fallthrough
CT: control target
= control target key end

     0   :  { %s862_s21 = smov 0   ;;  %s1166_s0 = inlined_call_operand.vmem [shape: f32[2,4,256], index: 0, kind: input, shape index: {}]   ;;  %s1167_s1 = inlined_call_operand.vmem [shape: f32[4,36], index: 1, kind: input, shape index: {}]   ;;  %s1168_s2 = inlined_call_operand.vmem [shape: f32[4,1], index: 2, kind: input, shape index: {}]   ;;  %s1169_s3 = inlined_call_operand.vmem [shape: f32[4,36], index: 3, kind: input, shape index: {}]   ;;  %s1170_s4 = inlined_call_operand.vmem [shape: f32[4,1], index: 4, kind: input, shape index: {}]   ;;  %s1171_s5 = inlined_call_operand.vmem [shape: f32[9,256], index: 5, kind: input, shape index: {}]   ;;  %s1172_s6 = inlined_call_operand.vmem [shape: f32[2,4,256], index: 6, kind: output, shape index: {}]  }
   0x1 LB: > { %s768_s22 = sadd.s32 4294967295, %s815_s21   ;;  %p772_p0 = scmp.ge.s32.totalorder %s815_s21, 1  ;;  %s815_s21 = sphi %s862_s21, %s16_s21  }
   0x2   : > { %p212_p1 = scmp.lt.s32.totalorder %s815_s21, 3 }
   0x4   : > { %p213_p2 = pnand %p772_p0, %p212_p1 }
   0x5   : > { %p242_p3 = scmp.lt.s32.totalorder (!%p213_p2), %s768_s22, 1  ;;  %s817_s27 = smov (!%p213_p2), 111  }
   0x6   : > { %216 = sbr.rel (%p213_p2) target bundleno = 718 (0x2ce), region = 44  ;;  %s818_s28 = smov (!%p213_p2), 112  }
   0x7   : > { %s819_s29 = smov (!%p213_p2), 127   ;;  %s820_s30 = smov (!%p213_p2), 113  }
   0x8   : > { %s821_s7 = smov (!%p213_p2), 1   ;;  %s822_s8 = smov (!%p213_p2), 16  }
   0x9   : > { %s825_s9 = smov (!%p213_p2), 15   ;;  %s826_s10 = smov (!%p213_p2), 17  }
   0xb   : > { %s1174_s22 = smov (!%p242_p3, %s768_s22), 1  ;;  %v823_v2 = vmov 0.0   ;;  %v824_v3 = vmov 0   ;;  %v432_v4 = vld [vmem:[%s1168_s2] sm:$0xf]  ;;  %v264_v5 = vlaneseq  ;;  %v928_v11 = vld [vmem:[%s1171_s5 + $0x8] sm:$0xff] }
   0xc   : > { %s787_s23 = sshll.u32 %s1174_s22, 3  ;;  %512 = vmatprep.mubr.f32.mxu0 %v823_v2  ;;  %697 = vmatprep.mubr.f32.mxu1 %v823_v2  ;;  %v934_v13 = vld [vmem:[%s1171_s5 + $0x10] ss:$0 sm:$0xff]  ;;  %v939_v14 = vld [vmem:[%s1171_s5 + $0x18] ss:$0 sm:$0xff]  ;;  %v944_v15 = vld [vmem:[%s1171_s5] sm:$0xff] }
   0xd   : > { %s246_s26 = scalar_lea.vmem %s1166_s0, %s787_s23  ;;  %807 = vset.pattern.permute.xlu0 %v824_v3  ;;  %v919_v6 = vshrl.u32 %v264_v5, 7  ;;  %v921_v7 = vand.u32 127, %v264_v5  ;;  %vm422_vm1 = vcmask 1043456   ;;  %vm438_vm9 = vcmask 293888  }
   0xe   : > { %v878_v0 = vld [vmem:[%s246_s26] sm:$0xff] }
   0xf   : > { %381 = vrot.lane.b32.xlu1 %v878_v0, %s817_s27  ;;  %364 = vrot.lane.b32.xlu0 %v878_v0, %s818_s28  ;;  %v886_v1 = vcombine.high %v878_v0, %v878_v0  ;;  %v339_v10 = vsub.s32 5, %v919_v6  ;;  %vm385_vm0 = vcmp.lt.s32.totalorder %v921_v7, 111  ;;  %v373_v12 = vsub.s32 7, %v919_v6 }
  0x10   : > { %vm334_vm2 = vcmp.lt.s32.totalorder %v921_v7, 127  ;;  %v356_v18 = vsub.s32 6, %v919_v6  ;;  %vm368_vm3 = vcmp.lt.s32.totalorder %v921_v7, 112  ;;  %vm351_vm4 = vcmp.lt.s32.totalorder %v921_v7, 113 }
  0x11   : > { %v953_v21 = vrot.slane %v928_v11, %v339_v10  ;;  %v959_v24 = vrot.slane %v944_v15, %v373_v12  ;;  %v962_v25 = vrot.slane %v928_v11, %v373_v12  ;;  %v965_v26 = vrot.slane %v944_v15, %v339_v10 }
  0x12   : > { %v970_v29 = vrot.slane %v944_v15, %v356_v18  ;;  %v985_v37 = vrot.slane %v928_v11, %v356_v18  ;;  %v322_v44 = vsub.s32 3, %v919_v6  ;;  %vm317_vm5 = vcmp.lt.s32.totalorder %v921_v7, 1 }
  0x13   : > { %330 = vrot.lane.b32.xlu0 %v878_v0, %s819_s29  ;;  %383 = vrot.lane.b32.xlu1 %v886_v1, %s817_s27  ;;  %v288_v56 = vsub.s32 1, %v919_v6  ;;  %v305_v60 = vsub.s32 2, %v919_v6  ;;  %vm283_vm6 = vcmp.lt.s32.totalorder %v921_v7, 16  ;;  %v271_v2 = vsub.s32 0, %v919_v6 }
  0x14   : > { %v999_v54 = vrot.slane %v944_v15, %v322_v44  ;;  %v1002_v55 = vrot.slane %v928_v11, %v322_v44  ;;  %vm300_vm7 = vcmp.lt.s32.totalorder %v921_v7, 15  ;;  %vm266_vm8 = vcmp.lt.s32.totalorder %v921_v7, 17  ;;  %v431_v44 = vld [vmem:[%s1167_s1] sm:$0xf] }
  0x15   : > { %v1019_v5 = vrot.slane %v944_v15, %v288_v56  ;;  %v1029_v10 = vrot.slane %v928_v11, %v305_v60  ;;  %v1037_v18 = vrot.slane %v944_v15, %v271_v2 }
  0x17   : > { %332 = vrot.lane.b32.xlu1 %v886_v1, %s819_s29  ;;  %366 = vrot.lane.b32.xlu0 %v886_v1, %s818_s28 }
  0x1b   : > { %349 = vrot.lane.b32.xlu1 %v886_v1, %s820_s30  ;;  %347 = vrot.lane.b32.xlu0 %v878_v0, %s820_s30 }
  0x1f   : > { %315 = vrot.lane.b32.xlu1 %v886_v1, %s821_s7  ;;  %313 = vrot.lane.b32.xlu0 %v878_v0, %s821_s7 }
  0x23   : > { %281 = vrot.lane.b32.xlu1 %v886_v1, %s822_s8  ;;  %279 = vrot.lane.b32.xlu0 %v878_v0, %s822_s8 }
  0x27   : > { %298 = vrot.lane.b32.xlu1 %v886_v1, %s825_s9  ;;  %296 = vrot.lane.b32.xlu0 %v878_v0, %s825_s9 }
  0x2b   : > { %262 = vrot.lane.b32.xlu1 %v886_v1, %s826_s10  ;;  %260 = vrot.lane.b32.xlu0 %v878_v0, %s826_s10 }
  0x2f   : > { %435 = vperm.xlu0 %807, %v432_v4  }
  0x81   : > { %v382_v8 = vpop.permute.xlu1 %381  ;;  %v365_v9 = vpop.permute.xlu0 %364 }
  0x85   : > { %v331_v16 = vpop.permute.xlu0 %330  ;;  %v384_v17 = vpop.permute.xlu1 %383 }
  0x86   : > { %v386_v19 = vsel %vm385_vm0, %v382_v8, %v384_v17  ;;  %v387_v20 = vsel %vm385_vm0, %v384_v17, %v382_v8  ;;  %v1022_v8 = vrot.slane %v928_v11, %v288_v56 }
  0x87   : > { %v396_v22 = vmul.f32 %v934_v13, %v386_v19  ;;  %v397_v23 = vmul.f32 %v939_v14, %v387_v20  ;;  %v1040_v19 = vrot.slane %v928_v11, %v271_v2 }
  0x89   : > { %779 = vmatprep.subr.msk.mxu0 %vm422_vm1, %v397_v23  ;;  %v333_v27 = vpop.permute.xlu1 %332  ;;  %v367_v28 = vpop.permute.xlu0 %366 }
  0x8a   : > { %v335_v30 = vsel %vm334_vm2, %v331_v16, %v333_v27  ;;  %v336_v31 = vsel %vm334_vm2, %v333_v27, %v331_v16  ;;  %v369_v32 = vsel %vm368_vm3, %v365_v9, %v367_v28  ;;  %v370_v33 = vsel %vm368_vm3, %v367_v28, %v365_v9  ;;  %780 = vmatpush1.msk.msra.mxu0 %vm422_vm1, %v396_v22 }
  0x8b   : > { %v346_v34 = vmul.f32 %v953_v21, %v336_v31  ;;  %v379_v35 = vmul.f32 %v959_v24, %v369_v32  ;;  %v380_v36 = vmul.f32 %v962_v25, %v370_v33  ;;  %v345_v38 = vmul.f32 %v965_v26, %v335_v30 }
  0x8c   : > { %v1026_v9 = vrot.slane %v944_v15, %v305_v60 }
  0x8d   : > { %v350_v39 = vpop.permute.xlu1 %349  ;;  %v348_v40 = vpop.permute.xlu0 %347  ;;  %v413_v41 = vrot.slane %v346_v34, 4  ;;  %v418_v45 = vrot.slane %v379_v35, 4  ;;  %v419_v46 = vrot.slane %v380_v36, 4  ;;  %v412_v49 = vrot.slane %v345_v38, 4 }
  0x8e   : > { %v352_v42 = vsel %vm351_vm4, %v348_v40, %v350_v39  ;;  %v353_v43 = vsel %vm351_vm4, %v350_v39, %v348_v40 }
  0x8f   : > { %v362_v47 = vmul.f32 %v970_v29, %v352_v42  ;;  %v363_v48 = vmul.f32 %v985_v37, %v353_v43  ;;  %v428_v59 = vsel %vm422_vm1, %v886_v1, %v413_v41  ;;  %v427_v61 = vsel %vm422_vm1, %v878_v0, %v412_v49 }
  0x91   : > { %v316_v50 = vpop.permute.xlu1 %315  ;;  %v314_v51 = vpop.permute.xlu0 %313  ;;  %v430_v52 = vsel %vm422_vm1, %v363_v48, %v419_v46  ;;  %v429_v53 = vsel %vm422_vm1, %v362_v47, %v418_v45 }
  0x92   : > { %472 = vmatprep.subr.mxu0 %v430_v52  ;;  %v318_v57 = vsel %vm317_vm5, %v314_v51, %v316_v50  ;;  %v319_v58 = vsel %vm317_vm5, %v316_v50, %v314_v51  ;;  %v618_v52 = vld [vmem:[%s1170_s4] sm:$0xf] }
  0x93   : > { %473 = vmatpush1.msra.mxu0 %v429_v53  ;;  %v328_v3 = vmul.f32 %v999_v54, %v319_v58  ;;  %v329_v4 = vmul.f32 %v1002_v55, %v318_v57 }
  0x94   : > { %474 = vmatprep.subr.mxu0 %v428_v59 }
  0x95   : > { %v282_v62 = vpop.permute.xlu1 %281  ;;  %475 = vmatpush1.msra.mxu0 %v427_v61  ;;  %v280_v63 = vpop.permute.xlu0 %279  ;;  %v406_v20 = vrot.slane %v328_v3, 4  ;;  %v407_v22 = vrot.slane %v329_v4, 4 }
  0x96   : > { %v284_v6 = vsel %vm283_vm6, %v280_v63, %v282_v62  ;;  %v285_v12 = vsel %vm283_vm6, %v282_v62, %v280_v63 }
  0x97   : > { %v294_v28 = vmul.f32 %v1019_v5, %v285_v12  ;;  %v295_v30 = vmul.f32 %v1022_v8, %v284_v6 }
  0x99   : > { %v299_v16 = vpop.permute.xlu1 %298  ;;  %v297_v17 = vpop.permute.xlu0 %296  ;;  %v400_v38 = vrot.slane %v294_v28, 4  ;;  %v401_v39 = vrot.slane %v295_v30, 4 }
  0x9a   : > { %v301_v23 = vsel %vm300_vm7, %v297_v17, %v299_v16  ;;  %v302_v27 = vsel %vm300_vm7, %v299_v16, %v297_v17 }
  0x9b   : > { %v311_v31 = vmul.f32 %v1026_v9, %v302_v27  ;;  %v312_v15 = vmul.f32 %v1029_v10, %v301_v23 }
  0x9d   : > { %v263_v32 = vpop.permute.xlu1 %262  ;;  %v261_v33 = vpop.permute.xlu0 %260  ;;  %v426_v11 = vsel %vm422_vm1, %v312_v15, %v407_v22  ;;  %v425_v34 = vsel %vm422_vm1, %v311_v31, %v406_v20 }
  0x9e   : > { %v267_v35 = vsel %vm266_vm8, %v261_v33, %v263_v32  ;;  %v268_v36 = vsel %vm266_vm8, %v263_v32, %v261_v33  ;;  %476 = vmatprep.subr.mxu0 %v426_v11 }
  0x9f   : > { %v277_v40 = vmul.f32 %v1037_v18, %v268_v36  ;;  %v278_v41 = vmul.f32 %v1040_v19, %v267_v35  ;;  %477 = vmatpush1.msra.mxu0 %v425_v34 }
  0xa1   : > { %v424_v42 = vsel %vm422_vm1, %v278_v41, %v401_v39  ;;  %v423_v43 = vsel %vm422_vm1, %v277_v40, %v400_v38 }
  0xa2   : > { %478 = vmatprep.subr.mxu0 %v424_v42 }
  0xa3   : > { %479 = vmatpush1.msra.mxu0 %v423_v43 }
  0xa4   : > { %781 = vmatmul.mubr.msk.f32.vlgmr.msra.gmra.mxu0 %vm438_vm9, %v431_v44 }
  0xaa   : > { %v436_v45 = vpop.permute.xlu0 %435 }
 0x164   : > { %v514_v46 = vpop.f32.mrf.mxu0 }
 0x165   : > { %v515_v47 = vadd.f32 %v514_v46, %v436_v45 }
 0x166   : > { %v516_v48 = vpop.f32.mrf.mxu0 }
 0x167   : > { %v1064_v49 = vmax.f32 %v515_v47, 0.0  ;;  %v517_v50 = vadd.f32 %v516_v48, %v436_v45 }
 0x169   : > { %577 = vrot.lane.b32.xlu0 %v1064_v49, %s817_s27  ;;  %569 = vrot.lane.b32.xlu1 %v1064_v49, %s818_s28  ;;  %v520_v51 = vmax.f32 %v517_v50, 0.0 }
 0x16d   : > { %553 = vrot.lane.b32.xlu0 %v1064_v49, %s819_s29  ;;  %571 = vrot.lane.b32.xlu1 %v520_v51, %s818_s28 }
 0x171   : > { %561 = vrot.lane.b32.xlu0 %v1064_v49, %s820_s30  ;;  %579 = vrot.lane.b32.xlu1 %v520_v51, %s817_s27 }
 0x175   : > { %545 = vrot.lane.b32.xlu0 %v1064_v49, %s821_s7  ;;  %555 = vrot.lane.b32.xlu1 %v520_v51, %s819_s29 }
 0x179   : > { %529 = vrot.lane.b32.xlu0 %v1064_v49, %s822_s8  ;;  %563 = vrot.lane.b32.xlu1 %v520_v51, %s820_s30 }
 0x17d   : > { %537 = vrot.lane.b32.xlu0 %v1064_v49, %s825_s9  ;;  %547 = vrot.lane.b32.xlu1 %v520_v51, %s821_s7 }
 0x181   : > { %521 = vrot.lane.b32.xlu0 %v1064_v49, %s826_s10  ;;  %531 = vrot.lane.b32.xlu1 %v520_v51, %s822_s8  ;;  %s251_s8 = scalar_lea.vmem %s1172_s6, %s787_s23 }
 0x185   : > { %621 = vperm.xlu0 %807, %v618_v52   ;;  %539 = vrot.lane.b32.xlu1 %v520_v51, %s825_s9 }
 0x189   : > { %523 = vrot.lane.b32.xlu1 %v520_v51, %s826_s10 }
 0x1db   : > { %v578_v53 = vpop.permute.xlu0 %577  ;;  %v570_v56 = vpop.permute.xlu1 %569 }
 0x1df   : > { %v554_v57 = vpop.permute.xlu0 %553  ;;  %v572_v58 = vpop.permute.xlu1 %571 }
 0x1e0   : > { %v573_v63 = vsel %vm368_vm3, %v570_v56, %v572_v58  ;;  %v574_v4 = vsel %vm368_vm3, %v572_v58, %v570_v56 }
 0x1e1   : > { %v575_v12 = vmul.f32 %v573_v63, %v959_v24 }
 0x1e3   : > { %v562_v59 = vpop.permute.xlu0 %561  ;;  %v580_v60 = vpop.permute.xlu1 %579  ;;  %v605_v27 = vrot.slane %v575_v12, 4 }
 0x1e4   : > { %v581_v61 = vsel %vm385_vm0, %v578_v53, %v580_v60  ;;  %v582_v62 = vsel %vm385_vm0, %v580_v60, %v578_v53  ;;  %v617_v60 = vld [vmem:[%s1169_s3] sm:$0xf] }
 0x1e5   : > { %v583_v2 = vmul.f32 %v934_v13, %v581_v61  ;;  %v584_v3 = vmul.f32 %v939_v14, %v582_v62  ;;  %v576_v13 = vmul.f32 %v574_v4, %v962_v25 }
 0x1e7   : > { %782 = vmatprep.subr.msk.mxu1 %vm422_vm1, %v584_v3  ;;  %v556_v6 = vpop.permute.xlu1 %555  ;;  %v546_v20 = vpop.permute.xlu0 %545  ;;  %v606_v30 = vrot.slane %v576_v13, 4 }
 0x1e8   : > { %v557_v16 = vsel %vm334_vm2, %v554_v57, %v556_v6  ;;  %v558_v17 = vsel %vm334_vm2, %v556_v6, %v554_v57  ;;  %783 = vmatpush1.msk.msra.mxu1 %vm422_vm1, %v583_v2 }
 0x1e9   : > { %v560_v14 = vmul.f32 %v558_v17, %v953_v21  ;;  %v559_v22 = vmul.f32 %v557_v16, %v965_v26 }
 0x1eb   : > { %v564_v23 = vpop.permute.xlu1 %563  ;;  %v600_v31 = vrot.slane %v560_v14, 4  ;;  %v599_v25 = vrot.slane %v559_v22, 4  ;;  %v530_v33 = vpop.permute.xlu0 %529 }
 0x1ec   : > { %v565_v24 = vsel %vm351_vm4, %v562_v59, %v564_v23  ;;  %v566_v28 = vsel %vm351_vm4, %v564_v23, %v562_v59 }
 0x1ed   : > { %v567_v15 = vmul.f32 %v565_v24, %v970_v29  ;;  %v568_v32 = vmul.f32 %v566_v28, %v985_v37  ;;  %v614_v36 = vsel %vm422_vm1, %v520_v51, %v600_v31  ;;  %v613_v29 = vsel %vm422_vm1, %v1064_v49, %v599_v25 }
 0x1ef   : > { %v548_v11 = vpop.permute.xlu1 %547  ;;  %v616_v21 = vsel %vm422_vm1, %v568_v32, %v606_v30  ;;  %v615_v26 = vsel %vm422_vm1, %v567_v15, %v605_v27  ;;  %v538_v40 = vpop.permute.xlu0 %537 }
 0x1f0   : > { %657 = vmatprep.subr.mxu1 %v616_v21  ;;  %v549_v34 = vsel %vm317_vm5, %v546_v20, %v548_v11  ;;  %v550_v35 = vsel %vm317_vm5, %v548_v11, %v546_v20 }
 0x1f1   : > { %658 = vmatpush1.msra.mxu1 %v615_v26  ;;  %v551_v38 = vmul.f32 %v550_v35, %v999_v54  ;;  %v552_v39 = vmul.f32 %v549_v34, %v1002_v55 }
 0x1f2   : > { %659 = vmatprep.subr.mxu1 %v614_v36 }
 0x1f3   : > { %660 = vmatpush1.msra.mxu1 %v613_v29  ;;  %v532_v37 = vpop.permute.xlu1 %531  ;;  %v593_v44 = vrot.slane %v551_v38, 4  ;;  %v594_v45 = vrot.slane %v552_v39, 4  ;;  %v522_v50 = vpop.permute.xlu0 %521 }
 0x1f4   : > { %v533_v41 = vsel %vm283_vm6, %v530_v33, %v532_v37  ;;  %v534_v42 = vsel %vm283_vm6, %v532_v37, %v530_v33 }
 0x1f5   : > { %v535_v54 = vmul.f32 %v534_v42, %v1019_v5  ;;  %v536_v55 = vmul.f32 %v533_v41, %v1022_v8 }
 0x1f7   : > { %v540_v43 = vpop.permute.xlu1 %539  ;;  %v587_v5 = vrot.slane %v535_v54, 4  ;;  %v588_v58 = vrot.slane %v536_v55, 4 }
 0x1f8   : > { %v541_v46 = vsel %vm300_vm7, %v538_v40, %v540_v43  ;;  %v542_v47 = vsel %vm300_vm7, %v540_v43, %v538_v40 }
 0x1f9   : > { %v543_v48 = vmul.f32 %v542_v47, %v1026_v9  ;;  %v544_v49 = vmul.f32 %v541_v46, %v1029_v10 }
 0x1fb   : > { %v524_v51 = vpop.permute.xlu1 %523  ;;  %v612_v52 = vsel %vm422_vm1, %v544_v49, %v594_v45  ;;  %v611_v53 = vsel %vm422_vm1, %v543_v48, %v593_v44 }
 0x1fc   : > { %v525_v56 = vsel %vm266_vm8, %v522_v50, %v524_v51  ;;  %v526_v57 = vsel %vm266_vm8, %v524_v51, %v522_v50  ;;  %661 = vmatprep.subr.mxu1 %v612_v52 }
 0x1fd   : > { %v527_v8 = vmul.f32 %v526_v57, %v1037_v18  ;;  %v528_v9 = vmul.f32 %v525_v56, %v1040_v19  ;;  %662 = vmatpush1.msra.mxu1 %v611_v53 }
 0x1ff   : > { %v610_v10 = vsel %vm422_vm1, %v528_v9, %v588_v58  ;;  %v609_v59 = vsel %vm422_vm1, %v527_v8, %v587_v5 }
 0x200   : > { %663 = vmatprep.subr.mxu1 %v610_v10  ;;  %v622_v7 = vpop.permute.xlu0 %621 }
 0x201   : > { %664 = vmatpush1.msra.mxu1 %v609_v59 }
 0x202   : > { %784 = vmatmul.mubr.msk.f32.vlgmr.msra.gmra.mxu1 %vm438_vm9, %v617_v60 }
 0x2c2   : > { %v699_v61 = vpop.f32.mrf.mxu1 }
 0x2c3   : > { %v700_v62 = vadd.f32 %v699_v61, %v622_v7 }
 0x2c4   : > { %v701_v18 = vpop.f32.mrf.mxu1 }
 0x2c5   : > { %v704_v19 = vadd.f32 %v700_v62, %v878_v0  ;;  %v702_v63 = vadd.f32 %v701_v18, %v622_v7 }
 0x2c7   : > { %v705_v2 = vadd.f32 %v702_v63, %v886_v1  ;;  %v706_v3 = vmax.f32 %v704_v19, 0.0 }
 0x2c9   : > { %v707_v4 = vmax.f32 %v705_v2, 0.0 }
 0x2cb   : > { %v710_v6 = vcombine.low %v706_v3, %v707_v4 }
 0x2cd   : > { %712 = vst [vmem:[%s251_s8] sm:$0xff] %v710_v6 }
 0x2ce PF: > { %s16_s21 = sadd.s32 1, %s815_s21  }
 0x2cf   : > { %p13_p4 = scmp.ge.s32.totalorder %s16_s21, 4  }
 0x2d1   :  { %15 = sbr.rel (!%p13_p4) target bundleno = 1 (0x1), region = 74 }

</bundles_post_ra>
